<compile_context>
chip_gen: v7x
topology: tpu7x:2x2x1
jax: 0.10.0
libtpu: 0.0.40
codegen_flags: <defaults>
</compile_context>

<pallas_src>
import functools

import jax
import jax.numpy as jnp
from jax.experimental import pallas as pl
from jax.experimental.pallas import tpu as pltpu

HIDDEN = 128
_NEG_PAD = -1e30  # finite "-inf" for padded logit columns; MUST stay f32.


def _round_up(x, m):
    return ((x + m - 1) // m) * m


# ----------------------------------------------------------------------------
# Kernels
# ----------------------------------------------------------------------------
def _poimlp_kernel(x_ref, w1_ref, b1_ref, w2_ref, b2_ref, w3_ref, b3_ref, o_ref):
    """Single-pass path: whole (padded) output row in one lane-dense tile."""
    # Cast inside the kernel instead of a wrapper-side HBM pad/cast pass.
    x = x_ref[...].astype(w1_ref.dtype)

    h1 = jnp.dot(x, w1_ref[...], preferred_element_type=jnp.float32) + b1_ref[...]
    h1 = jnp.maximum(h1, 0.0)

    h2 = jnp.dot(h1.astype(w2_ref.dtype), w2_ref[...],
                 preferred_element_type=jnp.float32) + b2_ref[...]
    h2 = jnp.maximum(h2, 0.0)

    # Padded logit columns carry bias -1e30 -> exp underflows to exactly 0.
    logits = jnp.dot(h2.astype(w3_ref.dtype), w3_ref[...],
                     preferred_element_type=jnp.float32) + b3_ref[...]
    m = jnp.max(logits, axis=-1, keepdims=True)
    e = jnp.exp(logits - m)
    probs = e / jnp.sum(e, axis=-1, keepdims=True)   # exact divide (sum-to-1)

    o_ref[...] = probs.astype(o_ref.dtype)


def _poimlp_tiled_kernel(x_ref, w1_ref, b1_ref, w2_ref, b2_ref, w3_ref, b3_ref,
                         o_ref, h2_sc, m_sc, l_sc):
    """Large-vocab path: grid = (batch tiles, 2 softmax passes, out tiles).

    Pass 0 accumulates the running row max / sum over out tiles; pass 1
    recomputes each logits tile and writes normalized probabilities.  h2 is
    computed once per batch tile and cached in VMEM scratch.
    """
    p = pl.program_id(1)   # softmax pass: 0 = stats, 1 = write probs
    j = pl.program_id(2)   # out tile index

    @pl.when(jnp.logical_and(p == 0, j == 0))
    def _init():
        x = x_ref[...].astype(w1_ref.dtype)
        h1 = jnp.maximum(
            jnp.dot(x, w1_ref[...], preferred_element_type=jnp.float32)
            + b1_ref[...], 0.0)
        h2 = jnp.maximum(
            jnp.dot(h1.astype(w2_ref.dtype), w2_ref[...],
                    preferred_element_type=jnp.float32) + b2_ref[...], 0.0)
        h2_sc[...] = h2.astype(h2_sc.dtype)
        m_sc[...] = jnp.full_like(m_sc, -jnp.inf)
        l_sc[...] = jnp.zeros_like(l_sc)

    logits = jnp.dot(h2_sc[...], w3_ref[...],
                     preferred_element_type=jnp.float32) + b3_ref[...]

    @pl.when(p == 0)
    def _stats():
        m_new = jnp.maximum(m_sc[...], jnp.max(logits, axis=-1, keepdims=True))
        l_sc[...] = (l_sc[...] * jnp.exp(m_sc[...] - m_new)
                     + jnp.sum(jnp.exp(logits - m_new), axis=-1, keepdims=True))
        m_sc[...] = m_new

    @pl.when(p == 1)
    def _write():
        o_ref[...] = (jnp.exp(logits - m_sc[...]) / l_sc[...]).astype(o_ref.dtype)


# ----------------------------------------------------------------------------
# Parameter preparation (one-time; hoisted out of the per-call forward)
# ----------------------------------------------------------------------------
def init_poimlp_params(key, inp_size, out_size):
    """nn.Linear-style init U(-1/sqrt(fan_in), 1/sqrt(fan_in)); weights (in, out)."""
    ks = jax.random.split(key, 6)

    def linear(kw, kb, fan_in, fan_out):
        bound = 1.0 / jnp.sqrt(jnp.float32(fan_in))
        w = jax.random.uniform(kw, (fan_in, fan_out), jnp.float32, -bound, bound)
        b = jax.random.uniform(kb, (1, fan_out), jnp.float32, -bound, bound)
        return w, b

    w1, b1 = linear(ks[0], ks[1], inp_size, HIDDEN)
    w2, b2 = linear(ks[2], ks[3], HIDDEN, HIDDEN)
    w3, b3 = linear(ks[4], ks[5], HIDDEN, out_size)
    return {"w1": w1, "b1": b1, "w2": w2, "b2": b2, "w3": w3, "b3": b3}


def prepare_poimlp_params(params, *, compute_dtype=jnp.bfloat16, out_tile=128):
    """One-time pad/cast of the parameters.

    W3/b3 are padded along the output dim to a multiple of `out_tile`; the
    padded columns get zero weights and bias -1e30 (KEPT IN F32 -- do not cast
    b3 to bf16, -1e30 would overflow to -inf and risk NaN), so softmax over the
    padded width equals softmax over the true out_size.
    """
    out_size = params["w3"].shape[1]
    pad = _round_up(out_size, out_tile) - out_size
    return {
        "w1": params["w1"].astype(compute_dtype),
        "b1": params["b1"].reshape(1, -1).astype(jnp.float32),
        "w2": params["w2"].astype(compute_dtype),
        "b2": params["b2"].reshape(1, -1).astype(jnp.float32),
        "w3": jnp.pad(params["w3"], ((0, 0), (0, pad))).astype(compute_dtype),
        "b3": jnp.pad(params["b3"].reshape(1, -1).astype(jnp.float32),
                      ((0, 0), (0, pad)), constant_values=_NEG_PAD),
    }


def _vmem_limit_bytes(bt, inp_size, out_blk, out_dtype):
    """Static working-set estimate -> scoped VMEM limit (floor 32 MiB, cap 64 MiB)."""
    x_bytes = bt * inp_size * 4
    o_bytes = bt * out_blk * jnp.dtype(out_dtype).itemsize
    w_bytes = ((inp_size + HIDDEN) * HIDDEN * 4 + HIDDEN * out_blk * 4
               + (2 * HIDDEN + out_blk) * 4)
    tmp_bytes = bt * (3 * HIDDEN + 2 * out_blk) * 4      # h1/h2/logits/exp temps
    est = 2 * (x_bytes + o_bytes) + 2 * w_bytes + tmp_bytes
    return int(min(64 * 1024 * 1024, max(32 * 1024 * 1024, 2 * est)))


# ----------------------------------------------------------------------------
# Forward
# ----------------------------------------------------------------------------
@functools.partial(
    jax.jit,
    static_argnames=("out_size", "batch_tile", "out_tile",
                     "single_pass_max_out", "out_dtype"))
def poimlp_forward(x, prepped, *, out_size, batch_tile=1024, out_tile=128,
                   single_pass_max_out=512, out_dtype=jnp.float32):
    """x: (B, inp_size) f32.  prepped: output of prepare_poimlp_params().

    out_dtype=jnp.bfloat16 halves the dominant output HBM write (softmax math
    stays f32; only the store is cast).
    """
    B, inp_size = x.shape
    out_p = prepped["w3"].shape[1]
    assert prepped["w1"].shape[0] == inp_size
    assert out_p % out_tile == 0 and out_size <= out_p

    # Batch tile: large (amortize ~0.35 us/step overhead), 16-sublane aligned,
    # and split so the "parallel" batch axis has >= 2 steps (v7x: 2 TensorCores).
    align = 16
    bt = max(align, min(batch_tile, _round_up(B, align)))
    bt = _round_up(bt, align)
    if B > align and _round_up(B, bt) // bt < 2:
        bt = _round_up((B + 1) // 2, align)
    B_p = _round_up(B, bt)
    nb = B_p // bt
    x_p = x if B_p == B else jnp.pad(x, ((0, B_p - B), (0, 0)))

    w1, b1 = prepped["w1"], prepped["b1"]
    w2, b2 = prepped["w2"], prepped["b2"]
    w3, b3 = prepped["w3"], prepped["b3"]

    if out_p <= single_pass_max_out:
        # Fast path: one lane-dense output tile per batch tile; W3/b3 have a
        # constant block index -> resident across the whole grid.
        out = pl.pallas_call(
            _poimlp_kernel,
            out_shape=jax.ShapeDtypeStruct((B_p, out_p), out_dtype),
            grid_spec=pltpu.PrefetchScalarGridSpec(
                num_scalar_prefetch=0,
                grid=(nb,),
                in_specs=[
                    pl.BlockSpec((bt, inp_size), lambda i: (i, 0)),
                    pl.BlockSpec((inp_size, HIDDEN), lambda i: (0, 0)),
                    pl.BlockSpec((1, HIDDEN), lambda i: (0, 0)),
                    pl.BlockSpec((HIDDEN, HIDDEN), lambda i: (0, 0)),
                    pl.BlockSpec((1, HIDDEN), lambda i: (0, 0)),
                    pl.BlockSpec((HIDDEN, out_p), lambda i: (0, 0)),
                    pl.BlockSpec((1, out_p), lambda i: (0, 0)),
                ],
                out_specs=pl.BlockSpec((bt, out_p), lambda i: (i, 0)),
            ),
            compiler_params=pltpu.CompilerParams(
                dimension_semantics=("parallel",),
                vmem_limit_bytes=_vmem_limit_bytes(bt, inp_size, out_p, out_dtype),
            ),
        )(x_p, w1, b1, w2, b2, w3, b3)
    else:
        # Large-vocab path: tile the output dim; two-pass softmax with running
        # (m, l) in VMEM scratch.  Pass 0 parks the output index on (i, 0) and
        # writes nothing; pass 1 walks (i, j) and writes each tile exactly once
        # (no block is revisited after being left).
        nj = out_p // out_tile
        out = pl.pallas_call(
            _poimlp_tiled_kernel,
            out_shape=jax.ShapeDtypeStruct((B_p, out_p), out_dtype),
            grid_spec=pltpu.PrefetchScalarGridSpec(
                num_scalar_prefetch=0,
                grid=(nb, 2, nj),
                in_specs=[
                    pl.BlockSpec((bt, inp_size), lambda i, p, j: (i, 0)),
                    pl.BlockSpec((inp_size, HIDDEN), lambda i, p, j: (0, 0)),
                    pl.BlockSpec((1, HIDDEN), lambda i, p, j: (0, 0)),
                    pl.BlockSpec((HIDDEN, HIDDEN), lambda i, p, j: (0, 0)),
                    pl.BlockSpec((1, HIDDEN), lambda i, p, j: (0, 0)),
                    pl.BlockSpec((HIDDEN, out_tile), lambda i, p, j: (0, j)),
                    pl.BlockSpec((1, out_tile), lambda i, p, j: (0, j)),
                ],
                out_specs=pl.BlockSpec((bt, out_tile), lambda i, p, j: (i, j * p)),
                scratch_shapes=[
                    pltpu.VMEM((bt, HIDDEN), w3.dtype),   # cached h2
                    pltpu.VMEM((bt, 1), jnp.float32),     # running max
                    pltpu.VMEM((bt, 1), jnp.float32),     # running sum
                ],
            ),
            compiler_params=pltpu.CompilerParams(
                dimension_semantics=("parallel", "arbitrary", "arbitrary"),
                vmem_limit_bytes=_vmem_limit_bytes(bt, inp_size, out_tile, out_dtype),
            ),
        )(x_p, w1, b1, w2, b2, w3, b3)

    # NOTE: when B/out_size are already aligned this slice is a no-op; otherwise
    # callers that can consume the padded buffer may skip it downstream.
    return out[:B, :out_size]


# ----------------------------------------------------------------------------
# Pure-JAX reference (precision-matched: compute_dtype operands, f32 accumulate)
# ----------------------------------------------------------------------------
def poimlp_reference(x, p, compute_dtype=jnp.float32):
    cd = compute_dtype
    h1 = jnp.maximum(
        jnp.dot(x.astype(cd), p["w1"].astype(cd),
                preferred_element_type=jnp.float32) + p["b1"], 0.0)
    h2 = jnp.maximum(
        jnp.dot(h1.astype(cd), p["w2"].astype(cd),
                preferred_element_type=jnp.float32) + p["b2"], 0.0)
    logits = jnp.dot(h2.astype(cd), p["w3"].astype(cd),
                     preferred_element_type=jnp.float32) + p["b3"]
    return jax.nn.softmax(logits, axis=-1)


if __name__ == "__main__":
    key = jax.random.PRNGKey(0)
    k_param, k_param2, k_x = jax.random.split(key, 3)

    # --- Small-vocab case (single-pass path, resident W3) -------------------
    batch, inp_size, out_size = 64, 32, 16
    params = init_poimlp_params(k_param, inp_size, out_size)
    x = jax.random.normal(k_x, (batch, inp_size), jnp.float32)

    prepped_bf16 = prepare_poimlp_params(params, compute_dtype=jnp.bfloat16)
    ref_bf16 = poimlp_reference(x, params, compute_dtype=jnp.bfloat16)

    out = jax.block_until_ready(poimlp_forward(x, prepped_bf16, out_size=out_size))
    assert out.shape == (batch, out_size)
    assert jnp.allclose(out, ref_bf16, atol=2e-2, rtol=2e-2), "bf16 mismatch vs reference"
    assert jnp.allclose(jnp.sum(out, axis=-1), 1.0, atol=2e-3), "rows must sum to 1"

    # bf16 probabilities (halves the dominant output HBM write).
    out_b = jax.block_until_ready(
        poimlp_forward(x, prepped_bf16, out_size=out_size, out_dtype=jnp.bfloat16))
    assert out_b.dtype == jnp.bfloat16
    assert jnp.allclose(out_b.astype(jnp.float32), ref_bf16, atol=3e-2, rtol=3e-2)

    # Full-f32 compute path (tight tolerance; exact softmax divide).
    prepped_f32 = prepare_poimlp_params(params, compute_dtype=jnp.float32)
    ref_f32 = poimlp_reference(x, params, compute_dtype=jnp.float32)
    out_f32 = jax.block_until_ready(poimlp_forward(x, prepped_f32, out_size=out_size))
    assert jnp.allclose(out_f32, ref_f32, atol=1e-4, rtol=1e-4), "f32 mismatch vs reference"
    assert jnp.allclose(jnp.sum(out_f32, axis=-1), 1.0, atol=1e-4)

    # --- Larger-vocab case: exercise the out_p-tiled two-pass softmax path ---
    out_size2 = 300  # padded to 384 -> 3 out tiles of 128
    params2 = init_poimlp_params(k_param2, inp_size, out_size2)
    prepped2 = prepare_poimlp_params(params2, compute_dtype=jnp.bfloat16)
    ref2 = poimlp_reference(x, params2, compute_dtype=jnp.bfloat16)
    out2 = jax.block_until_ready(
        poimlp_forward(x, prepped2, out_size=out_size2, single_pass_max_out=0))
    assert out2.shape == (batch, out_size2)
    assert jnp.allclose(out2, ref2, atol=2e-2, rtol=2e-2), "tiled-path mismatch vs reference"
    assert jnp.allclose(jnp.sum(out2, axis=-1), 1.0, atol=2e-3)

    # TODO(synk): dropout_rate > 0 (training mode) would need pltpu.prng_seed /
    # prng_random_bits masking; the reference module defaults to 0 (identity).
    print("KERNEL_OK")
</pallas_src>

<mosaic_0001>
module attributes {stable_mosaic.version = 11 : i64} {
  func.func @_poimlp_kernel(%arg0: i32, %arg1: memref<32x32xf32, #tpu.memory_space<vmem>>, %arg2: memref<32x128xbf16, #tpu.memory_space<vmem>>, %arg3: memref<1x128xf32, #tpu.memory_space<vmem>>, %arg4: memref<128x128xbf16, #tpu.memory_space<vmem>>, %arg5: memref<1x128xf32, #tpu.memory_space<vmem>>, %arg6: memref<128x128xbf16, #tpu.memory_space<vmem>>, %arg7: memref<1x128xf32, #tpu.memory_space<vmem>>, %arg8: memref<32x128xf32, #tpu.memory_space<vmem>>) attributes {dimension_semantics = [#tpu.dimension_semantics<parallel>], iteration_bounds = array<i64: 2>, scalar_prefetch = 0 : i64, scratch_operands = 0 : i64, tpu.core_type = #tpu.core_type<tc>, window_params = [{transform_indices = @transform_0, window_bounds = array<i64: 32, 32>}, {pipeline_mode = #tpu.pipeline_mode<synchronous>, transform_indices = @transform_1, window_bounds = array<i64: 32, 128>}, {pipeline_mode = #tpu.pipeline_mode<synchronous>, transform_indices = @transform_2, window_bounds = array<i64: 1, 128>}, {pipeline_mode = #tpu.pipeline_mode<synchronous>, transform_indices = @transform_3, window_bounds = array<i64: 128, 128>}, {pipeline_mode = #tpu.pipeline_mode<synchronous>, transform_indices = @transform_4, window_bounds = array<i64: 1, 128>}, {pipeline_mode = #tpu.pipeline_mode<synchronous>, transform_indices = @transform_5, window_bounds = array<i64: 128, 128>}, {pipeline_mode = #tpu.pipeline_mode<synchronous>, transform_indices = @transform_6, window_bounds = array<i64: 1, 128>}, {transform_indices = @transform_7, window_bounds = array<i64: 32, 128>}]} {
    %c0 = arith.constant 0 : index
    %c0_0 = arith.constant 0 : index
    %0 = vector.load %arg1[%c0, %c0_0] : memref<32x32xf32, #tpu.memory_space<vmem>>, vector<32x32xf32>
    %1 = arith.truncf %0 : vector<32x32xf32> to vector<32x32xbf16>
    %c0_1 = arith.constant 0 : index
    %c0_2 = arith.constant 0 : index
    %2 = vector.load %arg2[%c0_1, %c0_2] : memref<32x128xbf16, #tpu.memory_space<vmem>>, vector<32x128xbf16>
    %cst = arith.constant dense<0.000000e+00> : vector<32x128xf32>
    %3 = tpu.matmul %1, %2, %cst {dimension_numbers = #tpu.dot_dimension_numbers<[1], [0], [0], [1], [0, 0, 1, 1], [], []>} : vector<32x32xbf16>, vector<32x128xbf16>, vector<32x128xf32> -> vector<32x128xf32>
    %c0_3 = arith.constant 0 : index
    %c0_4 = arith.constant 0 : index
    %4 = vector.load %arg3[%c0_3, %c0_4] : memref<1x128xf32, #tpu.memory_space<vmem>>, vector<1x128xf32>
    %5 = vector.broadcast %4 : vector<1x128xf32> to vector<32x128xf32>
    %6 = arith.addf %3, %5 : vector<32x128xf32>
    %cst_5 = arith.constant 0.000000e+00 : f32
    %7 = vector.broadcast %cst_5 : f32 to vector<32x128xf32>
    %8 = arith.maximumf %6, %7 : vector<32x128xf32>
    %9 = arith.truncf %8 : vector<32x128xf32> to vector<32x128xbf16>
    %c0_6 = arith.constant 0 : index
    %c0_7 = arith.constant 0 : index
    %10 = vector.load %arg4[%c0_6, %c0_7] : memref<128x128xbf16, #tpu.memory_space<vmem>>, vector<128x128xbf16>
    %cst_8 = arith.constant dense<0.000000e+00> : vector<32x128xf32>
    %11 = tpu.matmul %9, %10, %cst_8 {dimension_numbers = #tpu.dot_dimension_numbers<[1], [0], [0], [1], [0, 0, 1, 1], [], []>} : vector<32x128xbf16>, vector<128x128xbf16>, vector<32x128xf32> -> vector<32x128xf32>
    %c0_9 = arith.constant 0 : index
    %c0_10 = arith.constant 0 : index
    %12 = vector.load %arg5[%c0_9, %c0_10] : memref<1x128xf32, #tpu.memory_space<vmem>>, vector<1x128xf32>
    %13 = vector.broadcast %12 : vector<1x128xf32> to vector<32x128xf32>
    %14 = arith.addf %11, %13 : vector<32x128xf32>
    %cst_11 = arith.constant 0.000000e+00 : f32
    %15 = vector.broadcast %cst_11 : f32 to vector<32x128xf32>
    %16 = arith.maximumf %14, %15 : vector<32x128xf32>
    %17 = arith.truncf %16 : vector<32x128xf32> to vector<32x128xbf16>
    %c0_12 = arith.constant 0 : index
    %c0_13 = arith.constant 0 : index
    %18 = vector.load %arg6[%c0_12, %c0_13] : memref<128x128xbf16, #tpu.memory_space<vmem>>, vector<128x128xbf16>
    %cst_14 = arith.constant dense<0.000000e+00> : vector<32x128xf32>
    %19 = tpu.matmul %17, %18, %cst_14 {dimension_numbers = #tpu.dot_dimension_numbers<[1], [0], [0], [1], [0, 0, 1, 1], [], []>} : vector<32x128xbf16>, vector<128x128xbf16>, vector<32x128xf32> -> vector<32x128xf32>
    %c0_15 = arith.constant 0 : index
    %c0_16 = arith.constant 0 : index
    %20 = vector.load %arg7[%c0_15, %c0_16] : memref<1x128xf32, #tpu.memory_space<vmem>>, vector<1x128xf32>
    %21 = vector.broadcast %20 : vector<1x128xf32> to vector<32x128xf32>
    %22 = arith.addf %19, %21 : vector<32x128xf32>
    %cst_17 = arith.constant dense<0xFF800000> : vector<32xf32>
    %23 = vector.multi_reduction <maximumf>, %22, %cst_17 [1] : vector<32x128xf32> to vector<32xf32>
    %24 = vector.shape_cast %23 : vector<32xf32> to vector<32x1xf32>
    %25 = vector.broadcast %24 : vector<32x1xf32> to vector<32x128xf32>
    %26 = arith.subf %22, %25 : vector<32x128xf32>
    %27 = math.exp %26 : vector<32x128xf32>
    %cst_18 = arith.constant dense<0.000000e+00> : vector<32xf32>
    %28 = vector.multi_reduction <add>, %27, %cst_18 [1] : vector<32x128xf32> to vector<32xf32>
    %29 = vector.shape_cast %28 : vector<32xf32> to vector<32x1xf32>
    %30 = vector.broadcast %29 : vector<32x1xf32> to vector<32x128xf32>
    %31 = arith.divf %27, %30 : vector<32x128xf32>
    %c0_19 = arith.constant 0 : index
    %c0_20 = arith.constant 0 : index
    %32 = vector.load %arg8[%c0_19, %c0_20] : memref<32x128xf32, #tpu.memory_space<vmem>>, vector<32x128xf32>
    tpu.vector_store %arg8[%c0_19, %c0_20], %31 {strides = array<i32>} : memref<32x128xf32, #tpu.memory_space<vmem>>, vector<32x128xf32>,
    return
  }
  func.func @transform_0(%arg0: i32) -> (i32, i32) {
    %c0_i32 = arith.constant 0 : i32
    %c0_i32_0 = arith.constant 0 : i32
    return %arg0, %c0_i32 : i32, i32
  }
  func.func @transform_1(%arg0: i32) -> (i32, i32) {
    %c0_i32 = arith.constant 0 : i32
    %c0_i32_0 = arith.constant 0 : i32
    %c0_i32_1 = arith.constant 0 : i32
    return %c0_i32, %c0_i32_0 : i32, i32
  }
  func.func @transform_2(%arg0: i32) -> (i32, i32) {
    %c0_i32 = arith.constant 0 : i32
    %c0_i32_0 = arith.constant 0 : i32
    %c0_i32_1 = arith.constant 0 : i32
    return %c0_i32, %c0_i32_0 : i32, i32
  }
  func.func @transform_3(%arg0: i32) -> (i32, i32) {
    %c0_i32 = arith.constant 0 : i32
    %c0_i32_0 = arith.constant 0 : i32
    %c0_i32_1 = arith.constant 0 : i32
    return %c0_i32, %c0_i32_0 : i32, i32
  }
  func.func @transform_4(%arg0: i32) -> (i32, i32) {
    %c0_i32 = arith.constant 0 : i32
    %c0_i32_0 = arith.constant 0 : i32
    %c0_i32_1 = arith.constant 0 : i32
    return %c0_i32, %c0_i32_0 : i32, i32
  }
  func.func @transform_5(%arg0: i32) -> (i32, i32) {
    %c0_i32 = arith.constant 0 : i32
    %c0_i32_0 = arith.constant 0 : i32
    %c0_i32_1 = arith.constant 0 : i32
    return %c0_i32, %c0_i32_0 : i32, i32
  }
  func.func @transform_6(%arg0: i32) -> (i32, i32) {
    %c0_i32 = arith.constant 0 : i32
    %c0_i32_0 = arith.constant 0 : i32
    %c0_i32_1 = arith.constant 0 : i32
    return %c0_i32, %c0_i32_0 : i32, i32
  }
  func.func @transform_7(%arg0: i32) -> (i32, i32) {
    %c0_i32 = arith.constant 0 : i32
    %c0_i32_0 = arith.constant 0 : i32
    return %arg0, %c0_i32 : i32, i32
  }
}

</mosaic_0001>

<bundles_post_ra>
// kernel: poimlp_forward.1
= control target key start
LH: loop header
LB: loop body
LE: loop exit
PB: predicated region body
PF: predicated region fallthrough
CT: control target
= control target key end

     0   :  { %12 = vsyncpa [#allocation3], 0  ;;  %s989_s24 = smov 0   ;;  %s1094_s0 = inlined_call_operand.vmem [shape: f32[64,32], index: 0, kind: input, shape index: {}]   ;;  %s1095_s1 = inlined_call_operand.vmem [shape: bf16[32,128], index: 1, kind: input, shape index: {}]   ;;  %s1096_s2 = inlined_call_operand.vmem [shape: f32[1,128], index: 2, kind: input, shape index: {}]   ;;  %s1097_s3 = inlined_call_operand.vmem [shape: bf16[128,128], index: 3, kind: input, shape index: {}]   ;;  %s1098_s4 = inlined_call_operand.vmem [shape: f32[1,128], index: 4, kind: input, shape index: {}]   ;;  %s1099_s5 = inlined_call_operand.hbm [shape: bf16[128,128], index: 5, kind: input, shape index: {}]   ;;  %s1100_s6 = inlined_call_operand.vmem [shape: f32[1,128], index: 6, kind: input, shape index: {}]   ;;  %s1101_s7 = inlined_call_operand.vmem [shape: f32[64,128], index: 7, kind: output, shape index: {}]  }
   0x1 LB: > { %s743_s25 = sadd.s32 4294967295, %s944_s24   ;;  %p745_p0 = scmp.ge.s32.totalorder %s944_s24, 1  ;;  %s944_s24 = sphi %s989_s24, %s18_s24  }
   0x2   : > { %p201_p1 = scmp.lt.s32.totalorder %s944_s24, 3  ;;  %s946_s26 = smov [#allocation2]  }
   0x3   : > { %s225_s27 = sshll.u32 %s946_s26, 4  ;;  %p1003_p3 = scmp.eq.s32.totalorder %s743_s25, 0  ;;  %s226_s27 = int_to_ptr.vmem [resolvable:$true] %s225_s27 }
   0x4   : > { %p997_p2 = pnand %p745_p0, %p201_p1  ;;  %s906_s10 = scalar_lea.hbm %s1099_s5, 1024 }
   0x5   : > { %s1106_s29 = scalar_select %p1003_p3, 1, 0 }
   0x6   : > { %s1105_s28 = scalar_select %p997_p2, 1, 0 }
   0x7   : > { %p855_p4 = pneg %p997_p2  ;;  %p907_p6 = scmp.ne.s32.totalorder %s1099_s5, %s906_s10 }
   0x8   : > { %p913_p10 = scmp.lt.u32.totalorder %s906_s10, %s1099_s5 }
   0x9   : > { %p1011_p5 = pnand %p1003_p3, %p855_p4 }
   0xb   : > { %p908_p7 = pneg %p1011_p5 }
   0xd   : > { %p909_p8 = pnand %p908_p7, %p907_p6 }
   0xf   : > { %p910_p9 = pneg %p909_p8 }
  0x11   : > { %p915_p11 = pnand %p913_p10, %p910_p9 }
  0x13   : > { %918 = shalt.err (!%p915_p11)
}
  0x14   : > { %s919_s15 = scalar_lea.vmem %s226_s27, 1024  ;;  %p927_p1 = scmp.lt.s32.totalorder %s226_s27, %s226_s27 }
  0x15   : > { %p920_p12 = scmp.ne.s32.totalorder %s226_s27, %s919_s15  ;;  %p928_p4 = scmp.lt.s32.totalorder %s919_s15, %s919_s15 }
  0x17   : > { %p922_p13 = pnand %p920_p12, %p908_p7  ;;  %p929_p3 = por %p928_p4, %p927_p1 }
  0x19   : > { %p923_p0 = pneg %p922_p13 }
  0x1b   : > { %p930_p2 = pnand %p929_p3, %p923_p0 }
  0x1d   : > { %933 = shalt.err (!%p930_p2)
}
  0x1e   : > { %s947_s16 = smov 64   ;;  %s948_s17 = smov 4  }
  0x1f   : > { %858 = dma.hbm_to_vmem [thread:$0]  (!%p1011_p5), %s1099_s5, 1024, %s226_s27, [#allocation3], %s947_s16, %s947_s16, %s948_s17  }
  0x20   : > { %p1108_p6 = scmp.ne.s32.totalorder %s1105_s28, 0 }
  0x21   : > { %p1109_p8 = scmp.ne.s32.totalorder (!%p1108_p6), %s1106_s29, 0 }
  0x22   : > { %253 = sbr.rel (%p1108_p6) target bundleno = 1032 (0x408), region = 48 }
  0x29   : > { %939 = dma.done.wait (%p1109_p8), [#allocation3], 1024  }
  0x2a   : > { %941 = vsyncadd (%p1109_p8), [#allocation3], 4294966272  ;;  %s750_s20 = sshll.u32 %s743_s25, 2  ;;  %v872_v0 = vld [vmem:[%s1095_s1] sm:$0xff]   ;;  %v873_v1 = vld [vmem:[%s1095_s1 + $0x8] sm:$0xff]   ;;  %vm327_vm0 = vcmask 261120  }
  0x2b   : > { %p286_p2 = scmp.lt.s32.totalorder %s750_s20, 7  ;;  %803 = vmatprep.subr.bf16.mxu0 %v872_v0  ;;  %v874_v7 = vld [vmem:[%s1097_s3] sm:$0xff]   ;;  %v875_v8 = vld [vmem:[%s1097_s3 + $0x8] sm:$0xff]   ;;  %v876_v10 = vld [vmem:[%s1097_s3 + $0x10] sm:$0xff]  }
  0x2c   : > { %804 = vmatpush3.bf16.msra.mxu0 %v872_v0  ;;  %811 = vmatprep.subr.bf16.mxu1 %v874_v7  ;;  %v877_v11 = vld [vmem:[%s1097_s3 + $0x18] sm:$0xff]   ;;  %v878_v12 = vld [vmem:[%s1097_s3 + $0x20] sm:$0xff]   ;;  %v879_v13 = vld [vmem:[%s1097_s3 + $0x28] sm:$0xff]  }
  0x2d   : > { %s1111_s20 = smov (!%p286_p2, %s750_s20), 7  ;;  %805 = vmatprep.subr.bf16.mxu0 %v873_v1  ;;  %812 = vmatpush3.bf16.msra.mxu1 %v874_v7  ;;  %v880_v14 = vld [vmem:[%s1097_s3 + $0x30] sm:$0xff]   ;;  %v881_v15 = vld [vmem:[%s1097_s3 + $0x38] sm:$0xff]   ;;  %v882_v16 = vld [vmem:[#allocation2] sm:$0xff]  }
  0x2e   : > { %s751_s21 = sshll.u32 %s1111_s20, 3  ;;  %813 = vmatprep.subr.bf16.mxu1 %v875_v8  ;;  %v883_v17 = vld [vmem:[#allocation2 + $0x8] sm:$0xff]   ;;  %v884_v18 = vld [vmem:[#allocation2 + $0x10] sm:$0xff]   ;;  %v885_v19 = vld [vmem:[#allocation2 + $0x18] sm:$0xff]  }
  0x2f   : > { %s289_s26 = scalar_lea.vmem %s1094_s0, %s751_s21  ;;  %v886_v20 = vld [vmem:[#allocation2 + $0x20] sm:$0xff]   ;;  %v887_v21 = vld [vmem:[#allocation2 + $0x28] sm:$0xff]   ;;  %v888_v37 = vld [vmem:[#allocation2 + $0x30] sm:$0xff]   ;;  %s295_s11 = scalar_lea.vmem %s1101_s7, %s751_s21 }
  0x30   : > { %v298_v2 = vld [vmem:[%s289_s26] sm:$0xff]  ;;  %v299_v3 = vld [vmem:[%s289_s26 + $0x8] sm:$0xff]  ;;  %v300_v4 = vld [vmem:[%s289_s26 + $0x10] sm:$0xff]  ;;  %806 = vmatpush3.bf16.msra.mxu0 %v873_v1 }
  0x31   : > { %v302_v5 = vpack.c.bf16 %v299_v3, %v298_v2  ;;  %v301_v6 = vld [vmem:[%s289_s26 + $0x18] sm:$0xff]  ;;  %814 = vmatpush3.bf16.msra.mxu1 %v875_v8  ;;  %831 = vmatprep.subr.bf16.mxu0 %v882_v16  ;;  %v754_v22 = vld [vmem:[%s1096_s2] ss:$0 sm:$0xff] }
  0x32   : > { %v303_v9 = vpack.c.bf16 %v301_v6, %v300_v4  ;;  %815 = vmatprep.subr.bf16.mxu1 %v876_v10  ;;  %v889_v38 = vld [vmem:[#allocation2 + $0x38] sm:$0xff]   ;;  %v759_v39 = vld [vmem:[%s1098_s4] ss:$0 sm:$0xff] }
  0x33   : > { %807 = vmatprep.mubr.msk.bf16.mxu0 %vm327_vm0, %v302_v5  ;;  %v768_v54 = vld [vmem:[%s1100_s6] ss:$0 sm:$0xff] }
  0x34   : > { %808 = vmatmul.mubr.msk.bf16.vlgmr.msra.gmra.mrb[0].mxu0 %vm327_vm0, %v303_v9 }
  0x35   : > { %816 = vmatpush3.bf16.msra.mxu1 %v876_v10  ;;  %832 = vmatpush3.bf16.msra.mxu0 %v882_v16 }
  0x36   : > { %817 = vmatprep.subr.bf16.mxu1 %v877_v11  ;;  %833 = vmatprep.subr.bf16.mxu0 %v883_v17 }
  0x39   : > { %818 = vmatpush3.bf16.msra.mxu1 %v877_v11  ;;  %834 = vmatpush3.bf16.msra.mxu0 %v883_v17 }
  0x3a   : > { %819 = vmatprep.subr.bf16.mxu1 %v878_v12  ;;  %835 = vmatprep.subr.bf16.mxu0 %v884_v18 }
  0x3d   : > { %820 = vmatpush3.bf16.msra.mxu1 %v878_v12  ;;  %836 = vmatpush3.bf16.msra.mxu0 %v884_v18 }
  0x3e   : > { %821 = vmatprep.subr.bf16.mxu1 %v879_v13  ;;  %837 = vmatprep.subr.bf16.mxu0 %v885_v19 }
  0x41   : > { %822 = vmatpush3.bf16.msra.mxu1 %v879_v13  ;;  %838 = vmatpush3.bf16.msra.mxu0 %v885_v19 }
  0x42   : > { %823 = vmatprep.subr.bf16.mxu1 %v880_v14  ;;  %839 = vmatprep.subr.bf16.mxu0 %v886_v20 }
  0x45   : > { %824 = vmatpush3.bf16.msra.mxu1 %v880_v14  ;;  %840 = vmatpush3.bf16.msra.mxu0 %v886_v20 }
  0x46   : > { %825 = vmatprep.subr.bf16.mxu1 %v881_v15  ;;  %841 = vmatprep.subr.bf16.mxu0 %v887_v21 }
  0x49   : > { %826 = vmatpush3.bf16.msra.mxu1 %v881_v15  ;;  %842 = vmatpush3.bf16.msra.mxu0 %v887_v21 }
  0x4a   : > { %843 = vmatprep.subr.bf16.mxu0 %v888_v37 }
  0x4d   : > { %844 = vmatpush3.bf16.msra.mxu0 %v888_v37 }
  0x4e   : > { %845 = vmatprep.subr.bf16.mxu0 %v889_v38 }
  0x51   : > { %846 = vmatpush3.bf16.msra.mxu0 %v889_v38 }
 0x107   : > { %v809_v23 = vpop.f32.mrb[0].mxu0 }
 0x108   : > { %v377_v24 = vadd.f32 %v809_v23, %v754_v22  ;;  %v368_v25 = vpop.f32.mrb[1].mxu0 }
 0x109   : > { %v369_v26 = vadd.f32 %v754_v22, %v368_v25  ;;  %v810_v27 = vpop.f32.mrb[2].mxu0 }
 0x10a   : > { %v380_v28 = vadd.f32 %v810_v27, %v754_v22  ;;  %v371_v29 = vpop.f32.mrb[3].mxu0  ;;  %v385_v31 = vmax.f32 %v377_v24, 0.0 }
 0x10b   : > { %v372_v30 = vadd.f32 %v754_v22, %v371_v29  ;;  %v383_v33 = vmax.f32 %v369_v26, 0.0 }
 0x10c   : > { %v386_v32 = vmax.f32 %v380_v28, 0.0 }
 0x10d   : > { %v384_v34 = vmax.f32 %v372_v30, 0.0 }
 0x10e   : > { %v388_v35 = vpack.c.bf16 %v386_v32, %v385_v31 }
 0x10f   : > { %v387_v36 = vpack.c.bf16 %v384_v34, %v383_v33 }
 0x111   : > { %827 = vmatprep.mubr.bf16.mxu1 %v387_v36 }
 0x112   : > { %828 = vmatmul.mubr.bf16.vlgmr.msra.gmra.mrb[0].mxu1 %v388_v35 }
 0x1e5   : > { %v829_v40 = vpop.f32.mrb[0].mxu1 }
 0x1e6   : > { %v503_v41 = vadd.f32 %v829_v40, %v759_v39  ;;  %v494_v42 = vpop.f32.mrb[1].mxu1 }
 0x1e7   : > { %v495_v43 = vadd.f32 %v759_v39, %v494_v42  ;;  %v830_v44 = vpop.f32.mrb[2].mxu1 }
 0x1e8   : > { %v506_v45 = vadd.f32 %v830_v44, %v759_v39  ;;  %v497_v46 = vpop.f32.mrb[3].mxu1  ;;  %v511_v48 = vmax.f32 %v503_v41, 0.0 }
 0x1e9   : > { %v498_v47 = vadd.f32 %v759_v39, %v497_v46  ;;  %v509_v50 = vmax.f32 %v495_v43, 0.0 }
 0x1ea   : > { %v512_v49 = vmax.f32 %v506_v45, 0.0 }
 0x1eb   : > { %v510_v51 = vmax.f32 %v498_v47, 0.0 }
 0x1ec   : > { %v514_v52 = vpack.c.bf16 %v512_v49, %v511_v48 }
 0x1ed   : > { %v513_v53 = vpack.c.bf16 %v510_v51, %v509_v50 }
 0x1ef   : > { %847 = vmatprep.mubr.bf16.mxu0 %v513_v53 }
 0x1f0   : > { %848 = vmatmul.mubr.bf16.vlgmr.msra.gmra.mrb[4].mxu0 %v514_v52 }
 0x2c3   : > { %v849_v55 = vpop.f32.mrb[4].mxu0 }
 0x2c4   : > { %v629_v56 = vadd.f32 %v849_v55, %v768_v54  ;;  %v620_v57 = vpop.f32.mrb[5].mxu0 }
 0x2c5   : > { %v621_v58 = vadd.f32 %v768_v54, %v620_v57  ;;  %v850_v59 = vpop.f32.mrb[6].mxu0 }
 0x2c6   : > { %639 = vmax.xlane.f32.xlu1 %v629_v56  ;;  %v623_v60 = vpop.f32.mrb[7].mxu0  ;;  %v632_v61 = vadd.f32 %v850_v59, %v768_v54 }
 0x2c7   : > { %635 = vmax.xlane.f32.xlu0 %v621_v58  ;;  %v624_v62 = vadd.f32 %v768_v54, %v623_v60 }
 0x2ca   : > { %641 = vmax.xlane.f32.xlu1 %v632_v61 }
 0x2cb   : > { %637 = vmax.xlane.f32.xlu0 %v624_v62 }
 0x353   : > { %v640_v63 = vpop.xlane.xlu1 %639 }
 0x354   : > { %v645_v0 = vsub.f32 %v629_v56, %v640_v63  ;;  %v636_v1 = vpop.xlane.xlu0 %635 }
 0x355   : > { %v643_v2 = vsub.f32 %v621_v58, %v636_v1 }
 0x356   : > { %v651_v5 = vmul.f32 1.442695, %v645_v0 }
 0x357   : > { %v647_v3 = vmul.f32 1.442695, %v643_v2  ;;  %v642_v4 = vpop.xlane.xlu1 %641 }
 0x358   : > { %v638_v6 = vpop.xlane.xlu0 %637  ;;  %v646_v7 = vsub.f32 %v632_v61, %v642_v4 }
 0x359   : > { %890 = vpow2.f32 %v647_v3  ;;  %v644_v8 = vsub.f32 %v624_v62, %v638_v6 }
 0x35a   : > { %892 = vpow2.f32 %v651_v5  ;;  %v653_v10 = vmul.f32 1.442695, %v646_v7 }
 0x35b   : > { %v649_v9 = vmul.f32 1.442695, %v644_v8 }
 0x35d   : > { %894 = vpow2.f32 %v649_v9 }
 0x35e   : > { %896 = vpow2.f32 %v653_v10 }
 0x363   : > { %v891_v11 = vpop.eup %890 }
 0x364   : > { %655 = vadd.xlane.f32.xlu0 %v891_v11  ;;  %v893_v12 = vpop.eup %892 }
 0x367   : > { %v895_v13 = vpop.eup %894 }
 0x368   : > { %659 = vadd.xlane.f32.xlu0 %v893_v12  ;;  %657 = vadd.xlane.f32.xlu1 %v895_v13  ;;  %v897_v14 = vpop.eup %896 }
 0x36c   : > { %661 = vadd.xlane.f32.xlu1 %v897_v14 }
 0x3f1   : > { %v656_v15 = vpop.xlane.xlu0 %655 }
 0x3f2   : > { %898 = vrcp.f32 %v656_v15 }
 0x3f5   : > { %v658_v16 = vpop.xlane.xlu1 %657  ;;  %v660_v17 = vpop.xlane.xlu0 %659 }
 0x3f6   : > { %900 = vrcp.f32 %v658_v16 }
 0x3f7   : > { %902 = vrcp.f32 %v660_v17 }
 0x3f9   : > { %v662_v18 = vpop.xlane.xlu1 %661 }
 0x3fa   : > { %904 = vrcp.f32 %v662_v18 }
 0x3fc   : > { %v899_v19 = vpop.eup %898 }
 0x3fd   : > { %v664_v20 = vmul.f32 %v899_v19, %v891_v11 }
 0x3ff   : > { %671 = vst [vmem:[%s295_s11] sm:$0xff] %v664_v20 }
 0x400   : > { %v901_v21 = vpop.eup %900 }
 0x401   : > { %v903_v22 = vpop.eup %902  ;;  %v666_v23 = vmul.f32 %v901_v21, %v895_v13 }
 0x402   : > { %v668_v24 = vmul.f32 %v903_v22, %v893_v12 }
 0x403   : > { %672 = vst [vmem:[%s295_s11 + $0x8] sm:$0xff] %v666_v23 }
 0x404   : > { %v905_v25 = vpop.eup %904  ;;  %673 = vst [vmem:[%s295_s11 + $0x10] sm:$0xff] %v668_v24 }
 0x405   : > { %v670_v26 = vmul.f32 %v905_v25, %v897_v14 }
 0x407   : > { %674 = vst [vmem:[%s295_s11 + $0x18] sm:$0xff] %v670_v26 }
 0x408 PF: > { %s18_s24 = sadd.s32 1, %s944_s24  }
 0x409   : > { %p15_p3 = scmp.ge.s32.totalorder %s18_s24, 4  }
 0x40b   :  { %17 = sbr.rel (!%p15_p3) target bundleno = 1 (0x1), region = 83 }
 0x412   :  { %697 = vsyncpa [#allocation3], 1 }
 0x413   :  { %699 = vsyncpa [#allocation3 + $0x1], 1 }

</bundles_post_ra>
